<compile_context>
chip_gen: v7x
topology: tpu7x:2x2x1
jax: 0.10.0
libtpu: 0.0.40
codegen_flags: <defaults>
</compile_context>

<pallas_src>
import numpy as np
import jax
import jax.numpy as jnp
from jax.experimental import pallas as pl
from jax.experimental.pallas import tpu as pltpu

_VMEM = pl.BlockSpec(memory_space=pltpu.MemorySpace.VMEM)
_SMEM = pl.BlockSpec(memory_space=pltpu.MemorySpace.SMEM)

# 0/1 selection tensors mapping the 3x3 conv taps to a (196 -> 144) matmul:
#   K[p, q] = sum_{di,dj} w[di,dj] * TAPS[di,dj,p,q],  p = (i+di)*14+(j+dj), q = i*12+j
_CONV_TAPS = np.zeros((3, 3, 14 * 14, 12 * 12), np.float32)
for _di in range(3):
    for _dj in range(3):
        for _i in range(12):
            for _j in range(12):
                _CONV_TAPS[_di, _dj, (_i + _di) * 14 + (_j + _dj), _i * 12 + _j] = 1.0


def _vae_fused_kernel(x_ref, eps_ref, convmat_ref, scal_ref,
                      w1_ref, b1_ref, w2_ref, b2_ref,
                      w3_ref, b3_ref, w4_ref, b4_ref,
                      recon_ref, mulv_ref):
    """Fused encode + reparameterize + decode.

    scal_ref (SMEM, (3,)) = [conv_bias, bn_gamma, bn_beta].
    All FC weights arrive zero-padded so padded columns/rows contribute exactly 0.
    """
    x = x_ref[...]                                                       # (N, 196)

    # Conv2d(1,1,3,valid) as one MXU matmul with the im2col-expanded kernel.
    h = jnp.dot(x, convmat_ref[...], preferred_element_type=jnp.float32) # (N, 144)
    h = h + scal_ref[0]                                                  # conv bias
    # MaxPool2d(kernel_size=1) is the identity; then ReLU.
    h = jnp.maximum(h, 0.0)

    # BatchNorm2d(1), training mode: biased batch stats over all N*144 elements,
    # folded into a single scale/shift FMA.
    mean = jnp.mean(h)
    var = jnp.mean(jnp.square(h - mean))
    scale = scal_ref[1] * jax.lax.rsqrt(var + 1e-5)
    shift = scal_ref[2] - mean * scale
    h = h * scale + shift                                                # (N, 144)

    # fc1 (out padded 80 -> 128, padded cols stay exactly 0 after ReLU) + ReLU.
    h1 = jnp.dot(h, w1_ref[...], preferred_element_type=jnp.float32) + b1_ref[...]
    h1 = jnp.maximum(h1, 0.0)                                            # (N, 128)

    # Merged fc21 || fc22: cols [0:20] = mu, [20:40] = logvar, rest zero-padded.
    mulv = jnp.dot(h1, w2_ref[...], preferred_element_type=jnp.float32) + b2_ref[...]
    mulv_ref[...] = mulv                                                 # (N, 128) lane-dense store

    # Reparameterize: z = mu + eps * exp(logvar / 2).
    mu = mulv[:, :20]
    logvar = mulv[:, 20:40]
    z = mu + eps_ref[...] * jnp.exp(logvar * 0.5)                        # (N, 20)

    # Decode: fc3 -> fc4 -> sigmoid (no ReLU in the decode path).
    h3 = jnp.dot(z, w3_ref[...], preferred_element_type=jnp.float32) + b3_ref[...]   # (N, 128)
    h4 = jnp.dot(h3, w4_ref[...], preferred_element_type=jnp.float32) + b4_ref[...]  # (N, 256)
    recon_ref[...] = jax.nn.sigmoid(h4)                                  # (N, 256) lane-dense store


def init_params(key):
    """Deterministic synthetic parameters; shapes follow VAE.__init__.

    Linear weights are stored pre-transposed as (in, out) so kernels do x @ W
    directly (torch computes x @ W.T with W of shape (out, in))."""
    ks = jax.random.split(key, 12)

    def lin(kw, kb, fan_in, fan_out):
        bound = 1.0 / jnp.sqrt(jnp.float32(fan_in))
        w = jax.random.uniform(kw, (fan_in, fan_out), jnp.float32, -bound, bound)
        b = jax.random.uniform(kb, (1, fan_out), jnp.float32, -bound, bound)
        return w, b

    conv_w = jax.random.uniform(ks[0], (3, 3), jnp.float32, -1.0 / 3.0, 1.0 / 3.0)
    conv_b = jax.random.uniform(ks[1], (1,), jnp.float32, -1.0 / 3.0, 1.0 / 3.0)
    bn_gamma = jnp.ones((1,), jnp.float32)
    bn_beta = jnp.zeros((1,), jnp.float32)
    fc1_w, fc1_b = lin(ks[2], ks[3], 12 * 12, 80)
    fc21_w, fc21_b = lin(ks[4], ks[5], 80, 20)
    fc22_w, fc22_b = lin(ks[6], ks[7], 80, 20)
    fc3_w, fc3_b = lin(ks[8], ks[9], 20, 80)
    fc4_w, fc4_b = lin(ks[10], ks[11], 80, 14 * 14)
    return dict(conv_w=conv_w, conv_b=conv_b, bn_gamma=bn_gamma, bn_beta=bn_beta,
                fc1_w=fc1_w, fc1_b=fc1_b, fc21_w=fc21_w, fc21_b=fc21_b,
                fc22_w=fc22_w, fc22_b=fc22_b, fc3_w=fc3_w, fc3_b=fc3_b,
                fc4_w=fc4_w, fc4_b=fc4_b)


def vae_forward(params, x, eps):
    """x: (N, 1, 14, 14) NCHW, eps: (N, 20) standard normal draws."""
    n = x.shape[0]
    x_flat = x.astype(jnp.float32).reshape(n, 14 * 14)        # lane-dense (N, 196)

    # ---- pack / pad parameters for lane-dense MXU work (tiny, done in XLA) ----
    conv_mat = jnp.tensordot(params['conv_w'], _CONV_TAPS, axes=((0, 1), (0, 1)))   # (196, 144)
    scalars = jnp.concatenate([params['conv_b'], params['bn_gamma'], params['bn_beta']])  # (3,)
    w1p = jnp.pad(params['fc1_w'], ((0, 0), (0, 48)))          # (144, 128)
    b1p = jnp.pad(params['fc1_b'], ((0, 0), (0, 48)))          # (1, 128)
    w2p = jnp.pad(jnp.concatenate([params['fc21_w'], params['fc22_w']], axis=1),
                  ((0, 48), (0, 88)))                          # (128, 128): mu | logvar | 0
    b2p = jnp.pad(jnp.concatenate([params['fc21_b'], params['fc22_b']], axis=1),
                  ((0, 0), (0, 88)))                           # (1, 128)
    w3p = jnp.pad(params['fc3_w'], ((0, 0), (0, 48)))          # (20, 128)
    b3p = jnp.pad(params['fc3_b'], ((0, 0), (0, 48)))          # (1, 128)
    w4p = jnp.pad(params['fc4_w'], ((0, 48), (0, 60)))         # (128, 256)
    b4p = jnp.pad(params['fc4_b'], ((0, 0), (0, 60)))          # (1, 256)

    recon_p, mulv = pl.pallas_call(
        _vae_fused_kernel,
        out_shape=(jax.ShapeDtypeStruct((n, 256), jnp.float32),
                   jax.ShapeDtypeStruct((n, 128), jnp.float32)),
        in_specs=[_VMEM, _VMEM, _VMEM, _SMEM,
                  _VMEM, _VMEM, _VMEM, _VMEM, _VMEM, _VMEM, _VMEM, _VMEM],
        out_specs=(_VMEM, _VMEM),
    )(x_flat, eps, conv_mat, scalars, w1p, b1p, w2p, b2p, w3p, b3p, w4p, b4p)

    reconstruction = recon_p[:, :14 * 14].reshape(n, 1, 14, 14)
    mu = mulv[:, :20]
    logvar = mulv[:, 20:40]
    return reconstruction, mu, logvar


def _reference_forward(params, x, eps):
    """Pure-JAX reference (independent formulation: direct 9-tap conv)."""
    n = x.shape[0]
    xi = x[:, 0].astype(jnp.float32)
    acc = jnp.zeros((n, 12, 12), jnp.float32)
    for di in range(3):
        for dj in range(3):
            acc = acc + xi[:, di:di + 12, dj:dj + 12] * params['conv_w'][di, dj]
    acc = acc + params['conv_b'][0]
    h = jnp.maximum(acc, 0.0)
    mean = jnp.mean(h)
    var = jnp.mean((h - mean) ** 2)
    h = (h - mean) * jax.lax.rsqrt(var + 1e-5) * params['bn_gamma'][0] + params['bn_beta'][0]
    hf = h.reshape(n, 144)
    h1 = jnp.maximum(hf @ params['fc1_w'] + params['fc1_b'], 0.0)
    mu = h1 @ params['fc21_w'] + params['fc21_b']
    logvar = h1 @ params['fc22_w'] + params['fc22_b']
    z = mu + eps * jnp.exp(0.5 * logvar)
    h3 = z @ params['fc3_w'] + params['fc3_b']
    h4 = h3 @ params['fc4_w'] + params['fc4_b']
    return jax.nn.sigmoid(h4).reshape(n, 1, 14, 14), mu, logvar


if __name__ == "__main__":
    key = jax.random.PRNGKey(0)
    k_param, k_x, k_eps = jax.random.split(key, 3)

    params = init_params(k_param)
    # Input must be (N, 1, 14, 14): Conv2d(1,1,3) -> 12x12 feeds fc1(144, 80).
    x = jax.random.uniform(k_x, (2, 1, 14, 14), jnp.float32)
    # torch.randn_like(std) is injected as an explicit input for determinism.
    eps = jax.random.normal(k_eps, (2, 20), jnp.float32)

    fwd = jax.jit(vae_forward)
    recon, mu, logvar = fwd(params, x, eps)
    jax.block_until_ready((recon, mu, logvar))

    assert recon.shape == (2, 1, 14, 14)
    assert mu.shape == (2, 20) and logvar.shape == (2, 20)
    assert bool(jnp.all(jnp.isfinite(recon)))
    assert bool(jnp.all((recon >= 0.0) & (recon <= 1.0)))   # sigmoid output

    # Numerical check against a pure-JAX reference of the same forward pass.
    r_ref, mu_ref, lv_ref = _reference_forward(params, x, eps)
    assert bool(jnp.allclose(recon, r_ref, atol=1e-4, rtol=1e-4))
    assert bool(jnp.allclose(mu, mu_ref, atol=1e-4, rtol=1e-4))
    assert bool(jnp.allclose(logvar, lv_ref, atol=1e-4, rtol=1e-4))

    print("KERNEL_OK")
</pallas_src>

<mosaic_0001>
module attributes {stable_mosaic.version = 11 : i64} {
  func.func @_vae_fused_kernel(%arg0: memref<2x196xf32, #tpu.memory_space<vmem>>, %arg1: memref<2x20xf32, #tpu.memory_space<vmem>>, %arg2: memref<196x144xf32, #tpu.memory_space<vmem>>, %arg3: memref<3xf32, #tpu.memory_space<smem>>, %arg4: memref<144x128xf32, #tpu.memory_space<vmem>>, %arg5: memref<1x128xf32, #tpu.memory_space<vmem>>, %arg6: memref<128x128xf32, #tpu.memory_space<vmem>>, %arg7: memref<1x128xf32, #tpu.memory_space<vmem>>, %arg8: memref<20x128xf32, #tpu.memory_space<vmem>>, %arg9: memref<1x128xf32, #tpu.memory_space<vmem>>, %arg10: memref<128x256xf32, #tpu.memory_space<vmem>>, %arg11: memref<1x256xf32, #tpu.memory_space<vmem>>, %arg12: memref<2x256xf32, #tpu.memory_space<vmem>>, %arg13: memref<2x128xf32, #tpu.memory_space<vmem>>) attributes {dimension_semantics = [], scalar_prefetch = 0 : i64, scratch_operands = 0 : i64, tpu.core_type = #tpu.core_type<tc>} {
    %c0 = arith.constant 0 : index
    %c0_0 = arith.constant 0 : index
    %0 = vector.load %arg0[%c0, %c0_0] : memref<2x196xf32, #tpu.memory_space<vmem>>, vector<2x196xf32>
    %c0_1 = arith.constant 0 : index
    %c0_2 = arith.constant 0 : index
    %1 = vector.load %arg2[%c0_1, %c0_2] : memref<196x144xf32, #tpu.memory_space<vmem>>, vector<196x144xf32>
    %cst = arith.constant dense<0.000000e+00> : vector<2x144xf32>
    %2 = tpu.matmul %0, %1, %cst {dimension_numbers = #tpu.dot_dimension_numbers<[1], [0], [0], [1], [0, 0, 1, 1], [], []>} : vector<2x196xf32>, vector<196x144xf32>, vector<2x144xf32> -> vector<2x144xf32>
    %c0_3 = arith.constant 0 : index
    %3 = memref.load %arg3[%c0_3] : memref<3xf32, #tpu.memory_space<smem>>
    %4 = vector.broadcast %3 : f32 to vector<2x144xf32>
    %5 = arith.addf %2, %4 : vector<2x144xf32>
    %cst_4 = arith.constant 0.000000e+00 : f32
    %6 = vector.broadcast %cst_4 : f32 to vector<2x144xf32>
    %7 = arith.maximumf %5, %6 : vector<2x144xf32>
    %8 = vector.shape_cast %7 : vector<2x144xf32> to vector<1x2x144xf32>
    %cst_5 = arith.constant dense<0.000000e+00> : vector<1xf32>
    %9 = vector.multi_reduction <add>, %8, %cst_5 [1, 2] : vector<1x2x144xf32> to vector<1xf32>
    %10 = vector.shape_cast %9 : vector<1xf32> to vector<1x1x1xf32>
    %11 = vector.extract %10[0, 0, 0] : f32 from vector<1x1x1xf32>
    %cst_6 = arith.constant 2.880000e+02 : f32
    %12 = arith.divf %11, %cst_6 : f32
    %13 = vector.broadcast %12 : f32 to vector<2x144xf32>
    %14 = arith.subf %7, %13 : vector<2x144xf32>
    %15 = arith.mulf %14, %14 : vector<2x144xf32>
    %16 = vector.shape_cast %15 : vector<2x144xf32> to vector<1x2x144xf32>
    %cst_7 = arith.constant dense<0.000000e+00> : vector<1xf32>
    %17 = vector.multi_reduction <add>, %16, %cst_7 [1, 2] : vector<1x2x144xf32> to vector<1xf32>
    %18 = vector.shape_cast %17 : vector<1xf32> to vector<1x1x1xf32>
    %19 = vector.extract %18[0, 0, 0] : f32 from vector<1x1x1xf32>
    %cst_8 = arith.constant 2.880000e+02 : f32
    %20 = arith.divf %19, %cst_8 : f32
    %c1 = arith.constant 1 : index
    %21 = memref.load %arg3[%c1] : memref<3xf32, #tpu.memory_space<smem>>
    %cst_9 = arith.constant 9.99999974E-6 : f32
    %22 = arith.addf %20, %cst_9 : f32
    %23 = math.rsqrt %22 : f32
    %24 = arith.mulf %21, %23 : f32
    %c2 = arith.constant 2 : index
    %25 = memref.load %arg3[%c2] : memref<3xf32, #tpu.memory_space<smem>>
    %26 = arith.mulf %12, %24 : f32
    %27 = arith.subf %25, %26 : f32
    %28 = vector.broadcast %24 : f32 to vector<2x144xf32>
    %29 = arith.mulf %7, %28 : vector<2x144xf32>
    %30 = vector.broadcast %27 : f32 to vector<2x144xf32>
    %31 = arith.addf %29, %30 : vector<2x144xf32>
    %c0_10 = arith.constant 0 : index
    %c0_11 = arith.constant 0 : index
    %32 = vector.load %arg4[%c0_10, %c0_11] : memref<144x128xf32, #tpu.memory_space<vmem>>, vector<144x128xf32>
    %cst_12 = arith.constant dense<0.000000e+00> : vector<2x128xf32>
    %33 = tpu.matmul %31, %32, %cst_12 {dimension_numbers = #tpu.dot_dimension_numbers<[1], [0], [0], [1], [0, 0, 1, 1], [], []>} : vector<2x144xf32>, vector<144x128xf32>, vector<2x128xf32> -> vector<2x128xf32>
    %c0_13 = arith.constant 0 : index
    %c0_14 = arith.constant 0 : index
    %34 = vector.load %arg5[%c0_13, %c0_14] : memref<1x128xf32, #tpu.memory_space<vmem>>, vector<1x128xf32>
    %35 = vector.broadcast %34 : vector<1x128xf32> to vector<2x128xf32>
    %36 = arith.addf %33, %35 : vector<2x128xf32>
    %cst_15 = arith.constant 0.000000e+00 : f32
    %37 = vector.broadcast %cst_15 : f32 to vector<2x128xf32>
    %38 = arith.maximumf %36, %37 : vector<2x128xf32>
    %c0_16 = arith.constant 0 : index
    %c0_17 = arith.constant 0 : index
    %39 = vector.load %arg6[%c0_16, %c0_17] : memref<128x128xf32, #tpu.memory_space<vmem>>, vector<128x128xf32>
    %cst_18 = arith.constant dense<0.000000e+00> : vector<2x128xf32>
    %40 = tpu.matmul %38, %39, %cst_18 {dimension_numbers = #tpu.dot_dimension_numbers<[1], [0], [0], [1], [0, 0, 1, 1], [], []>} : vector<2x128xf32>, vector<128x128xf32>, vector<2x128xf32> -> vector<2x128xf32>
    %c0_19 = arith.constant 0 : index
    %c0_20 = arith.constant 0 : index
    %41 = vector.load %arg7[%c0_19, %c0_20] : memref<1x128xf32, #tpu.memory_space<vmem>>, vector<1x128xf32>
    %42 = vector.broadcast %41 : vector<1x128xf32> to vector<2x128xf32>
    %43 = arith.addf %40, %42 : vector<2x128xf32>
    %c0_21 = arith.constant 0 : index
    %c0_22 = arith.constant 0 : index
    %44 = vector.load %arg13[%c0_21, %c0_22] : memref<2x128xf32, #tpu.memory_space<vmem>>, vector<2x128xf32>
    tpu.vector_store %arg13[%c0_21, %c0_22], %43 {strides = array<i32>} : memref<2x128xf32, #tpu.memory_space<vmem>>, vector<2x128xf32>,
    %45 = vector.extract_strided_slice %43 {offsets = [0, 0], sizes = [2, 20], strides = [1, 1]} : vector<2x128xf32> to vector<2x20xf32>
    %46 = vector.extract_strided_slice %43 {offsets = [0, 20], sizes = [2, 20], strides = [1, 1]} : vector<2x128xf32> to vector<2x20xf32>
    %c0_23 = arith.constant 0 : index
    %c0_24 = arith.constant 0 : index
    %47 = vector.load %arg1[%c0_23, %c0_24] : memref<2x20xf32, #tpu.memory_space<vmem>>, vector<2x20xf32>
    %cst_25 = arith.constant 5.000000e-01 : f32
    %48 = vector.broadcast %cst_25 : f32 to vector<2x20xf32>
    %49 = arith.mulf %46, %48 : vector<2x20xf32>
    %50 = math.exp %49 : vector<2x20xf32>
    %51 = arith.mulf %47, %50 : vector<2x20xf32>
    %52 = arith.addf %45, %51 : vector<2x20xf32>
    %c0_26 = arith.constant 0 : index
    %c0_27 = arith.constant 0 : index
    %53 = vector.load %arg8[%c0_26, %c0_27] : memref<20x128xf32, #tpu.memory_space<vmem>>, vector<20x128xf32>
    %cst_28 = arith.constant dense<0.000000e+00> : vector<2x128xf32>
    %54 = tpu.matmul %52, %53, %cst_28 {dimension_numbers = #tpu.dot_dimension_numbers<[1], [0], [0], [1], [0, 0, 1, 1], [], []>} : vector<2x20xf32>, vector<20x128xf32>, vector<2x128xf32> -> vector<2x128xf32>
    %c0_29 = arith.constant 0 : index
    %c0_30 = arith.constant 0 : index
    %55 = vector.load %arg9[%c0_29, %c0_30] : memref<1x128xf32, #tpu.memory_space<vmem>>, vector<1x128xf32>
    %56 = vector.broadcast %55 : vector<1x128xf32> to vector<2x128xf32>
    %57 = arith.addf %54, %56 : vector<2x128xf32>
    %c0_31 = arith.constant 0 : index
    %c0_32 = arith.constant 0 : index
    %58 = vector.load %arg10[%c0_31, %c0_32] : memref<128x256xf32, #tpu.memory_space<vmem>>, vector<128x256xf32>
    %cst_33 = arith.constant dense<0.000000e+00> : vector<2x256xf32>
    %59 = tpu.matmul %57, %58, %cst_33 {dimension_numbers = #tpu.dot_dimension_numbers<[1], [0], [0], [1], [0, 0, 1, 1], [], []>} : vector<2x128xf32>, vector<128x256xf32>, vector<2x256xf32> -> vector<2x256xf32>
    %c0_34 = arith.constant 0 : index
    %c0_35 = arith.constant 0 : index
    %60 = vector.load %arg11[%c0_34, %c0_35] : memref<1x256xf32, #tpu.memory_space<vmem>>, vector<1x256xf32>
    %61 = vector.broadcast %60 : vector<1x256xf32> to vector<2x256xf32>
    %62 = arith.addf %59, %61 : vector<2x256xf32>
    %63 = arith.negf %62 : vector<2x256xf32>
    %64 = math.exp %63 : vector<2x256xf32>
    %cst_36 = arith.constant 1.000000e+00 : f32
    %65 = vector.broadcast %cst_36 : f32 to vector<2x256xf32>
    %66 = arith.addf %65, %64 : vector<2x256xf32>
    %67 = arith.divf %65, %66 : vector<2x256xf32>
    %c0_37 = arith.constant 0 : index
    %c0_38 = arith.constant 0 : index
    %68 = vector.load %arg12[%c0_37, %c0_38] : memref<2x256xf32, #tpu.memory_space<vmem>>, vector<2x256xf32>
    tpu.vector_store %arg12[%c0_37, %c0_38], %67 {strides = array<i32>} : memref<2x256xf32, #tpu.memory_space<vmem>>, vector<2x256xf32>,
    return
  }
}

</mosaic_0001>

<bundles_post_ra>
// kernel: vae_forward.1
= control target key start
LH: loop header
LB: loop body
LE: loop exit
PB: predicated region body
PF: predicated region fallthrough
CT: control target
= control target key end

     0   :  { %19 = vsyncpa [#allocation3], 0  ;;  %s1450_s0 = inlined_call_operand.vmem [shape: f32[2,196], index: 0, kind: input, shape index: {}]   ;;  %s1451_s1 = inlined_call_operand.vmem [shape: f32[2,20], index: 1, kind: input, shape index: {}]   ;;  %s1452_s2 = inlined_call_operand.vmem [shape: f32[196,144], index: 2, kind: input, shape index: {}]   ;;  %s1453_s3 = inlined_call_operand.vmem [shape: f32[3], index: 3, kind: input, shape index: {}]   ;;  %s1454_s4 = inlined_call_operand.vmem [shape: f32[144,128], index: 4, kind: input, shape index: {}]   ;;  %s1455_s5 = inlined_call_operand.vmem [shape: f32[1,128], index: 5, kind: input, shape index: {}]   ;;  %s1456_s6 = inlined_call_operand.vmem [shape: f32[128,128], index: 6, kind: input, shape index: {}]   ;;  %s1457_s7 = inlined_call_operand.vmem [shape: f32[1,128], index: 7, kind: input, shape index: {}]   ;;  %s1458_s8 = inlined_call_operand.vmem [shape: f32[20,128], index: 8, kind: input, shape index: {}]   ;;  %s1459_s9 = inlined_call_operand.vmem [shape: f32[1,128], index: 9, kind: input, shape index: {}]   ;;  %s1460_s10 = inlined_call_operand.vmem [shape: f32[128,256], index: 10, kind: input, shape index: {}]   ;;  %s1461_s11 = inlined_call_operand.vmem [shape: f32[1,256], index: 11, kind: input, shape index: {}]   ;;  %s1462_s12 = inlined_call_operand.vmem [shape: f32[2,256], index: 12, kind: output, shape index: {0}]   ;;  %s1463_s13 = inlined_call_operand.vmem [shape: f32[2,128], index: 13, kind: output, shape index: {1}]  }
   0x1   :  { %s32_s27 = sshll.u32 %s1453_s3, 4  ;;  %s33_s27 = int_to_ptr.vmem [resolvable:$true] %s32_s27 }
   0x2   :  { %s930_s28 = scalar_lea.vmem %s33_s27, 16  ;;  %p935_p1 = scmp.lt.s32.totalorder %s33_s27, %s33_s27 }
   0x3   :  { %p931_p0 = scmp.ne.s32.totalorder %s33_s27, %s930_s28  ;;  %p936_p2 = scmp.lt.s32.totalorder %s930_s28, %s930_s28 }
   0x5   :  { %p937_p3 = por %p936_p2, %p935_p1 }
   0x7   :  { %p938_p4 = pnand %p937_p3, %p931_p0 }
   0x9   :  { %941 = shalt.err (!%p938_p4)
}
   0xa   :  { %s944_s29 = smov [#allocation2]  }
   0xb   :  { %35 = dma.vmem_to_smem %s33_s27, 16, %s944_s29, [#allocation3]  }
   0xc   :  { %942 = dma.done.wait [#allocation3], 16  }
   0xd   :  { %943 = vsyncadd [#allocation3], 4294967280 }
   0xe   :  { %55 = sfence }
   0xf   :  { %v58_v0 = vld [vmem:[%s1452_s2 + $0x8] sm:$0xff]  ;;  %v60_v1 = vld [vmem:[%s1452_s2 + $0x18] sm:$0xff]  ;;  %v57_v2 = vld [vmem:[%s1452_s2] sm:$0xff]  ;;  %vm119_vm0 = vcmask 556032   ;;  %vm122_vm1 = vcmask 1043456   ;;  %s107_s21 = sld [smem:[#allocation2]] }
  0x10   :  { %v773_v3 = vpack.c.bf16 %v60_v1, %v58_v0  ;;  %v59_v4 = vld [vmem:[%s1452_s2 + $0x10] sm:$0xff]  ;;  %v62_v5 = vld [vmem:[%s1452_s2 + $0x28] sm:$0xff]  ;;  %v64_v6 = vld [vmem:[%s1452_s2 + $0x38] sm:$0xff]  ;;  %vm202_vm2 = vcmask 1041408   ;;  %vm204_vm3 = vcmask 123904   ;;  %s698_s26 = sld [smem:[#allocation2 + $0x2]] }
  0x11   :  { %v775_v7 = vpack.c.bf16 %v59_v4, %v57_v2  ;;  %v777_v8 = vpack.c.bf16 %v64_v6, %v62_v5  ;;  %v61_v9 = vld [vmem:[%s1452_s2 + $0x20] sm:$0xff]  ;;  %v63_v10 = vld [vmem:[%s1452_s2 + $0x30] sm:$0xff]  ;;  %v66_v11 = vld [vmem:[%s1452_s2 + $0x48] sm:$0xff]  ;;  %vm279_vm4 = vcmask 130048   ;;  %vm946_vm5 = vmmov 0   ;;  %s948_s15 = smov 108  }
  0x12   :  { %774 = vmatprep.subr.bf16.mxu0 %v773_v3  ;;  %v68_v12 = vld [vmem:[%s1452_s2 + $0x58] sm:$0xff]  ;;  %v779_v13 = vpack.c.bf16 %v63_v10, %v61_v9  ;;  %v65_v15 = vld [vmem:[%s1452_s2 + $0x40] sm:$0xff]  ;;  %v67_v16 = vld [vmem:[%s1452_s2 + $0x50] sm:$0xff]  ;;  %vm468_vm6 = vcmask 162816  }
  0x13   :  { %776 = vmatpush1.bf16.msra.mxu0 %v775_v7  ;;  %v781_v14 = vpack.c.bf16 %v68_v12, %v66_v11  ;;  %v70_v17 = vld [vmem:[%s1452_s2 + $0x68] sm:$0xff]  ;;  %v72_v18 = vld [vmem:[%s1452_s2 + $0x78] sm:$0xff]  ;;  %v783_v19 = vpack.c.bf16 %v67_v16, %v65_v15  ;;  %v69_v21 = vld [vmem:[%s1452_s2 + $0x60] sm:$0xff] }
  0x14   :  { %778 = vmatprep.subr.bf16.mxu0 %v777_v8  ;;  %v785_v20 = vpack.c.bf16 %v72_v18, %v70_v17  ;;  %v71_v22 = vld [vmem:[%s1452_s2 + $0x70] sm:$0xff]  ;;  %v74_v23 = vld [vmem:[%s1452_s2 + $0x88] sm:$0xff]  ;;  %v76_v24 = vld [vmem:[%s1452_s2 + $0x98] sm:$0xff] }
  0x15   :  { %v787_v25 = vpack.c.bf16 %v71_v22, %v69_v21  ;;  %v789_v26 = vpack.c.bf16 %v76_v24, %v74_v23  ;;  %v73_v27 = vld [vmem:[%s1452_s2 + $0x80] sm:$0xff]  ;;  %v75_v28 = vld [vmem:[%s1452_s2 + $0x90] sm:$0xff]  ;;  %v78_v29 = vld [vmem:[%s1452_s2 + $0xa8] sm:$0xff]  ;;  %v108_v12 = vstv %s107_s21 }
  0x16   :  { %v80_v30 = vld [vmem:[%s1452_s2 + $0xb8] sm:$0xff]  ;;  %v791_v31 = vpack.c.bf16 %v75_v28, %v73_v27  ;;  %v77_v33 = vld [vmem:[%s1452_s2 + $0xa0] sm:$0xff]  ;;  %v79_v34 = vld [vmem:[%s1452_s2 + $0xb0] sm:$0xff] }
  0x17   :  { %780 = vmatpush1.bf16.msra.mxu0 %v779_v13  ;;  %v793_v32 = vpack.c.bf16 %v80_v30, %v78_v29  ;;  %v693_v35 = vld.sshfl [vmem:[%s1450_s0] sm:$0x33 pattern:$0x76325410]  ;;  %v82_v36 = vld [vmem:[%s1452_s2 + $0xc8] sm:$0xff]  ;;  %v84_v37 = vld [vmem:[%s1452_s2 + $0xd8] sm:$0xff]  ;;  %v795_v39 = vpack.c.bf16 %v79_v34, %v77_v33 }
  0x18   :  { %782 = vmatprep.subr.bf16.mxu0 %v781_v14  ;;  %v117_v38 = vcombine.high %v693_v35, %v693_v35  ;;  %v797_v40 = vpack.c.bf16 %v84_v37, %v82_v36  ;;  %v81_v41 = vld [vmem:[%s1452_s2 + $0xc0] sm:$0xff]  ;;  %v83_v42 = vld [vmem:[%s1452_s2 + $0xd0] sm:$0xff]  ;;  %v86_v43 = vld [vmem:[%s1452_s2 + $0xe8] sm:$0xff] }
  0x19   :  { %v88_v44 = vld [vmem:[%s1452_s2 + $0xf8] sm:$0xff]  ;;  %v799_v45 = vpack.c.bf16 %v83_v42, %v81_v41  ;;  %v85_v47 = vld [vmem:[%s1452_s2 + $0xe0] sm:$0xff]  ;;  %v87_v48 = vld [vmem:[%s1452_s2 + $0xf0] sm:$0xff] }
  0x1a   :  { %696 = vmatprep.mubr.msk.f32.mxu0 %vm119_vm0, %v117_v38  ;;  %v801_v46 = vpack.c.bf16 %v88_v44, %v86_v43  ;;  %v90_v49 = vld [vmem:[%s1452_s2 + $0x108] sm:$0xff]  ;;  %v92_v50 = vld [vmem:[%s1452_s2 + $0x118] sm:$0xff]  ;;  %v803_v51 = vpack.c.bf16 %v87_v48, %v85_v47  ;;  %v89_v53 = vld [vmem:[%s1452_s2 + $0x100] sm:$0xff] }
  0x1b   :  { %784 = vmatpush1.bf16.msra.mxu0 %v783_v19  ;;  %v805_v52 = vpack.c.bf16 %v92_v50, %v90_v49  ;;  %v91_v54 = vld [vmem:[%s1452_s2 + $0x110] sm:$0xff]  ;;  %v94_v55 = vld [vmem:[%s1452_s2 + $0x128] sm:$0xff]  ;;  %v96_v56 = vld [vmem:[%s1452_s2 + $0x138] sm:$0xff] }
  0x1c   :  { %786 = vmatprep.subr.bf16.mxu0 %v785_v20  ;;  %v807_v57 = vpack.c.bf16 %v91_v54, %v89_v53  ;;  %v809_v58 = vpack.c.bf16 %v96_v56, %v94_v55  ;;  %v93_v59 = vld [vmem:[%s1452_s2 + $0x120] sm:$0xff]  ;;  %v95_v60 = vld [vmem:[%s1452_s2 + $0x130] sm:$0xff]  ;;  %v98_v61 = vld [vmem:[%s1452_s2 + $0x148] sm:$0xff] }
  0x1d   :  { %v100_v62 = vld [vmem:[%s1452_s2 + $0x158] sm:$0xff]  ;;  %v811_v63 = vpack.c.bf16 %v95_v60, %v93_v59  ;;  %v97_v1 = vld [vmem:[%s1452_s2 + $0x140] sm:$0xff]  ;;  %v99_v2 = vld [vmem:[%s1452_s2 + $0x150] sm:$0xff] }
  0x1e   :  { %v813_v0 = vpack.c.bf16 %v100_v62, %v98_v61  ;;  %v102_v3 = vld [vmem:[%s1452_s2 + $0x168] sm:$0xff]  ;;  %v104_v4 = vld [vmem:[%s1452_s2 + $0x178] sm:$0xff]  ;;  %v815_v5 = vpack.c.bf16 %v99_v2, %v97_v1  ;;  %v101_v7 = vld [vmem:[%s1452_s2 + $0x160] sm:$0xff] }
  0x1f   :  { %788 = vmatpush1.bf16.msra.mxu0 %v787_v25  ;;  %v817_v6 = vpack.c.bf16 %v104_v4, %v102_v3  ;;  %v103_v8 = vld [vmem:[%s1452_s2 + $0x170] sm:$0xff]  ;;  %v106_v10 = vld [vmem:[%s1452_s2 + $0x188] sm:$0xf]  ;;  %v105_v11 = vld [vmem:[%s1452_s2 + $0x180] sm:$0xf] }
  0x20   :  { %790 = vmatprep.subr.bf16.mxu0 %v789_v26  ;;  %v819_v9 = vpack.c.bf16 %v103_v8, %v101_v7  ;;  %v254_v37 = vld [vmem:[%s1454_s4] sm:$0xff]  ;;  %v255_v38 = vld [vmem:[%s1454_s4 + $0x8] sm:$0xff]  ;;  %v257_v42 = vld [vmem:[%s1454_s4 + $0x18] sm:$0xff] }
  0x21   :  { %v822_v41 = vpack.c.bf16 %v255_v38, %v254_v37  ;;  %v258_v44 = vld [vmem:[%s1454_s4 + $0x20] sm:$0xff]  ;;  %v260_v47 = vld [vmem:[%s1454_s4 + $0x30] sm:$0xff]  ;;  %v261_v48 = vld [vmem:[%s1454_s4 + $0x38] sm:$0xff] }
  0x22   :  { %v831_v49 = vpack.c.bf16 %v261_v48, %v260_v47  ;;  %v262_v50 = vld [vmem:[%s1454_s4 + $0x40] sm:$0xff]  ;;  %v264_v53 = vld [vmem:[%s1454_s4 + $0x50] sm:$0xff]  ;;  %v265_v54 = vld [vmem:[%s1454_s4 + $0x58] sm:$0xff] }
  0x23   :  { %792 = vmatpush1.bf16.msra.mxu0 %v791_v31  ;;  %v837_v55 = vpack.c.bf16 %v265_v54, %v264_v53  ;;  %v266_v56 = vld [vmem:[%s1454_s4 + $0x60] sm:$0xff]  ;;  %v268_v61 = vld [vmem:[%s1454_s4 + $0x70] sm:$0xff]  ;;  %v269_v62 = vld [vmem:[%s1454_s4 + $0x78] sm:$0xff] }
  0x24   :  { %794 = vmatprep.subr.bf16.mxu0 %v793_v32  ;;  %v270_v1 = vld [vmem:[%s1454_s4 + $0x80] sm:$0xff]  ;;  %v271_v2 = vld [vmem:[%s1454_s4 + $0x88] sm:$0xff]  ;;  %v368_v37 = vld [vmem:[%s1456_s6 + $0x70] sm:$0xff] }
  0x25   :  { %v846_v4 = vpack.c.bf16 %v271_v2, %v270_v1  ;;  %v369_v38 = vld [vmem:[%s1456_s6 + $0x78] sm:$0xff]  ;;  %v458_v47 = vld [vmem:[%s1458_s8] sm:$0xff]  ;;  %v551_v2 = vld [vmem:[%s1460_s10 + $0x30] sm:$0xff] }
  0x26   :  { %v549_v1 = vld [vmem:[%s1460_s10 + $0x20] sm:$0xff] }
  0x27   :  { %796 = vmatpush1.bf16.msra.mxu0 %v795_v39  ;;  %v256_v39 = vld [vmem:[%s1454_s4 + $0x10] sm:$0xff] }
  0x28   :  { %798 = vmatprep.subr.bf16.mxu0 %v797_v40  ;;  %v945_v40 = vmov 0.0|0.0   ;;  %v825_v43 = vpack.c.bf16 %v257_v42, %v256_v39  ;;  %v870_v39 = vpack.c.bf16 %v369_v38, %v368_v37  ;;  %v699_v42 = vld [vmem:[%s1455_s5] ss:$0 sm:$0xff] }
  0x29   :  { %821 = vmatprep.subr.bf16.mxu1 %v945_v40  ;;  %v448_v38 = vld [vmem:[%s1451_s1] sm:$0x3] }
  0x2a   :  { %823 = vmatpush1.bf16.msra.mxu1 %v822_v41  ;;  %v947_v41 = vmov 0.0  }
  0x2b   :  { %800 = vmatpush1.bf16.msra.mxu0 %v799_v45  ;;  %824 = vmatprep.subr.bf16.mxu1 %v945_v40  ;;  %v259_v45 = vld [vmem:[%s1454_s4 + $0x28] sm:$0xff] }
  0x2c   :  { %802 = vmatprep.subr.bf16.mxu0 %v801_v46  ;;  %v828_v46 = vpack.c.bf16 %v259_v45, %v258_v44 }
  0x2e   :  { %826 = vmatpush1.bf16.msra.mxu1 %v825_v43 }
  0x2f   :  { %804 = vmatpush1.bf16.msra.mxu0 %v803_v51  ;;  %827 = vmatprep.subr.bf16.mxu1 %v945_v40  ;;  %v263_v51 = vld [vmem:[%s1454_s4 + $0x48] sm:$0xff] }
  0x30   :  { %806 = vmatprep.subr.bf16.mxu0 %v805_v52  ;;  %v834_v52 = vpack.c.bf16 %v263_v51, %v262_v50 }
  0x32   :  { %829 = vmatpush1.bf16.msra.mxu1 %v828_v46 }
  0x33   :  { %808 = vmatpush1.bf16.msra.mxu0 %v807_v57  ;;  %830 = vmatprep.subr.bf16.mxu1 %v945_v40  ;;  %v267_v57 = vld [vmem:[%s1454_s4 + $0x68] sm:$0xff]  ;;  %s697_s4 = sld [smem:[#allocation2 + $0x1]] }
  0x34   :  { %810 = vmatprep.subr.bf16.mxu0 %v809_v58  ;;  %v840_v58 = vpack.c.bf16 %v267_v57, %v266_v56  ;;  %v546_v56 = vld [vmem:[%s1460_s10 + $0x8] sm:$0xff]  ;;  %v548_v57 = vld [vmem:[%s1460_s10 + $0x18] sm:$0xff] }
  0x36   :  { %832 = vmatpush1.bf16.msra.mxu1 %v831_v49  ;;  %v701_v49 = vld [vmem:[%s1457_s7] ss:$0 sm:$0xff] }
  0x37   :  { %812 = vmatpush1.bf16.msra.mxu0 %v811_v63  ;;  %833 = vmatprep.subr.bf16.mxu1 %v945_v40  ;;  %v843_v63 = vpack.c.bf16 %v269_v62, %v268_v61  ;;  %v550_v61 = vld [vmem:[%s1460_s10 + $0x28] sm:$0xff]  ;;  %v552_v62 = vld [vmem:[%s1460_s10 + $0x38] sm:$0xff] }
  0x38   :  { %814 = vmatprep.subr.bf16.mxu0 %v813_v0 }
  0x3a   :  { %835 = vmatpush1.bf16.msra.mxu1 %v834_v52 }
  0x3b   :  { %816 = vmatpush1.bf16.msra.mxu0 %v815_v5  ;;  %836 = vmatprep.subr.bf16.mxu1 %v945_v40 }
  0x3c   :  { %818 = vmatprep.subr.bf16.mxu0 %v817_v6 }
  0x3e   :  { %838 = vmatpush1.bf16.msra.mxu1 %v837_v55  ;;  %v460_v55 = vld [vmem:[%s1458_s8 + $0x10] sm:$0xf] }
  0x3f   :  { %820 = vmatpush1.bf16.msra.mxu0 %v819_v9  ;;  %839 = vmatprep.subr.bf16.mxu1 %v945_v40 }
  0x40   :  { %694 = vmatprep.subr.msk.mxu0 %vm122_vm1, %v106_v10 }
  0x42   :  { %841 = vmatpush1.bf16.msra.mxu1 %v840_v58  ;;  %v545_v58 = vld [vmem:[%s1460_s10] sm:$0xff] }
  0x43   :  { %695 = vmatpush1.msk.msra.mxu0 %vm122_vm1, %v105_v11  ;;  %842 = vmatprep.subr.bf16.mxu1 %v945_v40  ;;  %v354_v11 = vld [vmem:[%s1456_s6] sm:$0xff] }
  0x44   :  { %194 = vmatmul.mubr.f32.vlgmr.msra.gmra.mrb[0].mxu0 %v693_v35 }
  0x45   :  { %653 = vmatprep.mubr.f32.mxu0 %v947_v41 }
  0x46   :  { %844 = vmatpush1.bf16.msra.mxu1 %v843_v63 }
  0x47   :  { %845 = vmatprep.subr.bf16.mxu1 %v945_v40 }
  0x4a   :  { %847 = vmatpush1.bf16.msra.mxu1 %v846_v4  ;;  %v556_v4 = vld [vmem:[%s1460_s10 + $0x58] sm:$0xff] }
  0x4b   :  { %848 = vmatprep.subr.bf16.mxu1 %v945_v40 }
 0x117   :  { %v195_v13 = vpop.f32.mrb[0].mxu0 }
 0x118   :  { %v196_v14 = vadd.f32 %v195_v13, %v108_v12  ;;  %v197_v15 = vpop.f32.mrb[1].mxu0 }
 0x119   :  { %v198_v16 = vadd.f32 %v197_v15, %v108_v12  ;;  %v355_v12 = vld [vmem:[%s1456_s6 + $0x8] sm:$0xff] }
 0x11a   :  { %v1177_v17 = vmax.f32 %v196_v14, 0.0 }
 0x11b   :  { %v1179_v18 = vmax.f32 %v198_v16, 0.0 }
 0x11c   :  { %v203_v19 = vsel %vm202_vm2, %v1177_v17, 0.0 }
 0x11d   :  { %v205_v20 = vsel %vm204_vm3, %v1179_v18, 0.0 }
 0x11e   :  { %v206_v21 = vadd.f32 %v205_v20, %v203_v19  ;;  %v849_v20 = vpack.c.bf16 %v355_v12, %v354_v11 }
 0x120   :  { %207 = vadd.xlane.f32.xlu0 %v206_v21  ;;  %v356_v21 = vld [vmem:[%s1456_s6 + $0x10] sm:$0xff] }
 0x1ad   :  { %v208_v22 = vpop.xlane.xlu0 %207 }
 0x1ae   :  { %v209_v23 = vrot.slane %v208_v22, 4 }
 0x1b0   :  { %v210_v24 = vadd.f32 %v209_v23, %v208_v22  ;;  %v357_v22 = vld [vmem:[%s1456_s6 + $0x18] sm:$0xff] }
 0x1b1   :  { %v852_v23 = vpack.c.bf16 %v357_v22, %v356_v21  ;;  %v561_v22 = vld [vmem:[%s1460_s10 + $0x80] sm:$0xff] }
 0x1b2   :  { %v211_v25 = vrot.slane %v210_v24, 2 }
 0x1b4   :  { %v212_v26 = vadd.f32 %v211_v25, %v210_v24  ;;  %v360_v25 = vld [vmem:[%s1456_s6 + $0x30] sm:$0xff] }
 0x1b6   :  { %v213_v27 = vrot.slane %v212_v26, 1 }
 0x1b8   :  { %v214_v28 = vadd.f32 %v213_v27, %v212_v26  ;;  %v361_v26 = vld [vmem:[%s1456_s6 + $0x38] sm:$0xff] }
 0x1b9   :  { %v858_v27 = vpack.c.bf16 %v361_v26, %v360_v25  ;;  %v565_v26 = vld [vmem:[%s1460_s10 + $0xa0] sm:$0xff] }
 0x1ba   :  { %907 = vpush %v214_v28  ;;  %v362_v28 = vld [vmem:[%s1456_s6 + $0x40] sm:$0xff] }
 0x1eb   :  { %s1185_s2 = spop %907 }
 0x1ec   :  { %s218_s22 = smul.f32 0.0034722222, %s1185_s2 }
 0x1ee   :  { %v219_v29 = vstv %s218_s22 }
 0x1ef   :  { %v220_v30 = vsub.f32 %v1177_v17, %v219_v29  ;;  %v221_v31 = vsub.f32 %v1179_v18, %v219_v29  ;;  %v363_v29 = vld [vmem:[%s1456_s6 + $0x48] sm:$0xff] }
 0x1f1   :  { %v222_v32 = vmul.f32 %v220_v30, %v220_v30  ;;  %v223_v33 = vmul.f32 %v221_v31, %v221_v31  ;;  %v861_v30 = vpack.c.bf16 %v363_v29, %v362_v28  ;;  %v364_v31 = vld [vmem:[%s1456_s6 + $0x50] sm:$0xff]  ;;  %v570_v28 = vld [vmem:[%s1460_s10 + $0xc8] sm:$0xff]  ;;  %v572_v29 = vld [vmem:[%s1460_s10 + $0xd8] sm:$0xff] }
 0x1f3   :  { %v224_v34 = vsel %vm202_vm2, %v222_v32, 0.0  ;;  %v225_v35 = vsel %vm204_vm3, %v223_v33, 0.0  ;;  %v365_v32 = vld [vmem:[%s1456_s6 + $0x58] sm:$0xff] }
 0x1f4   :  { %v226_v36 = vadd.f32 %v225_v35, %v224_v34  ;;  %v864_v33 = vpack.c.bf16 %v365_v32, %v364_v31  ;;  %v366_v34 = vld [vmem:[%s1456_s6 + $0x60] sm:$0xff]  ;;  %v367_v35 = vld [vmem:[%s1456_s6 + $0x68] sm:$0xff]  ;;  %v899_v31 = vpack.c.bf16 %v572_v29, %v570_v28 }
 0x1f5   :  { %v569_v32 = vld [vmem:[%s1460_s10 + $0xc0] sm:$0xff] }
 0x1f6   :  { %227 = vadd.xlane.f32.xlu0 %v226_v36  ;;  %v867_v36 = vpack.c.bf16 %v367_v35, %v366_v34  ;;  %v574_v34 = vld [vmem:[%s1460_s10 + $0xe8] sm:$0xff]  ;;  %v576_v35 = vld [vmem:[%s1460_s10 + $0xf8] sm:$0xff] }
 0x1f7   :  { %v903_v37 = vpack.c.bf16 %v576_v35, %v574_v34 }
 0x283   :  { %v228_v59 = vpop.xlane.xlu0 %227 }
 0x284   :  { %v229_v60 = vrot.slane %v228_v59, 4 }
 0x286   :  { %v230_v0 = vadd.f32 %v229_v60, %v228_v59  ;;  %v875_v59 = vpack.c.bf16 %v548_v57, %v546_v56  ;;  %v547_v60 = vld [vmem:[%s1460_s10 + $0x10] sm:$0xff] }
 0x287   :  { %v877_v63 = vpack.c.bf16 %v547_v60, %v545_v58 }
 0x288   :  { %v231_v3 = vrot.slane %v230_v0, 2  ;;  %876 = vmatprep.subr.bf16.mxu0 %v875_v59 }
 0x289   :  { %878 = vmatpush1.bf16.msra.mxu0 %v877_v63 }
 0x28a   :  { %v232_v5 = vadd.f32 %v231_v3, %v230_v0  ;;  %v879_v0 = vpack.c.bf16 %v552_v62, %v550_v61  ;;  %v554_v3 = vld [vmem:[%s1460_s10 + $0x48] sm:$0xff] }
 0x28c   :  { %v233_v6 = vrot.slane %v232_v5, 1  ;;  %880 = vmatprep.subr.bf16.mxu0 %v879_v0 }
 0x28e   :  { %v234_v7 = vadd.f32 %v233_v6, %v232_v5  ;;  %v881_v5 = vpack.c.bf16 %v551_v2, %v549_v1  ;;  %v883_v6 = vpack.c.bf16 %v556_v4, %v554_v3 }
 0x290   :  { %909 = vpush %v234_v7  ;;  %v553_v7 = vld [vmem:[%s1460_s10 + $0x40] sm:$0xff]  ;;  %882 = vmatpush1.bf16.msra.mxu0 %v881_v5 }
 0x291   :  { %884 = vmatprep.subr.bf16.mxu0 %v883_v6 }
 0x2c1   :  { %s910_s23 = spop %909 }
 0x2c2   :  { %s238_s24 = smul.f32 0.0034722222, %s910_s23 }
 0x2c4   :  { %s240_s25 = sadd.f32 1e-05, %s238_s24 }
 0x2c6   :  { %v241_v8 = vstv %s240_s25 }
 0x2c7   :  { %918 = vrsqrt.f32 %v241_v8  ;;  %v555_v8 = vld [vmem:[%s1460_s10 + $0x50] sm:$0xff] }
 0x2c8   :  { %v885_v12 = vpack.c.bf16 %v555_v8, %v553_v7 }
 0x2ca   :  { %886 = vmatpush1.bf16.msra.mxu0 %v885_v12 }
 0x2d1   :  { %v919_v9 = vpop.eup %918 }
 0x2d2   :  { %911 = vpush %v919_v9  ;;  %v558_v9 = vld [vmem:[%s1460_s10 + $0x68] sm:$0xff] }
 0x303   :  { %s912_s27 = spop %911 }
 0x304   :  { %s244_s28 = smul.f32 %s912_s27, %s697_s4 }
 0x306   :  { %s246_s29 = smul.f32 %s244_s28, %s218_s22  ;;  %v248_v10 = vstv %s244_s28 }
 0x307   :  { %v249_v13 = vmul.f32 %v248_v10, %v1177_v17  ;;  %v250_v14 = vmul.f32 %v248_v10, %v1179_v18  ;;  %v358_v17 = vld [vmem:[%s1456_s6 + $0x20] sm:$0xff]  ;;  %v359_v18 = vld [vmem:[%s1456_s6 + $0x28] sm:$0xff]  ;;  %v560_v10 = vld [vmem:[%s1460_s10 + $0x78] sm:$0xff] }
 0x308   :  { %s247_s30 = ssub.f32 %s698_s26, %s246_s29  ;;  %v855_v24 = vpack.c.bf16 %v359_v18, %v358_v17  ;;  %v566_v17 = vld [vmem:[%s1460_s10 + $0xa8] sm:$0xff]  ;;  %v568_v18 = vld [vmem:[%s1460_s10 + $0xb8] sm:$0xff] }
 0x309   :  { %v895_v25 = vpack.c.bf16 %v568_v18, %v566_v17 }
 0x30a   :  { %v251_v15 = vstv %s247_s30 }
 0x30b   :  { %v252_v16 = vadd.f32 %v251_v15, %v249_v13  ;;  %v253_v19 = vadd.f32 %v251_v15, %v250_v14  ;;  %v887_v13 = vpack.c.bf16 %v560_v10, %v558_v9  ;;  %v557_v14 = vld [vmem:[%s1460_s10 + $0x60] sm:$0xff]  ;;  %v559_v15 = vld [vmem:[%s1460_s10 + $0x70] sm:$0xff] }
 0x30d   :  { %700 = vmatprep.mubr.msk.f32.mxu1 %vm279_vm4, %v253_v19  ;;  %v564_v19 = vld [vmem:[%s1460_s10 + $0x98] sm:$0xff]  ;;  %888 = vmatprep.subr.bf16.mxu0 %v887_v13 }
 0x30e   :  { %348 = vmatmul.mubr.f32.vlgmr.msra.gmra.mrb[0].mxu1 %v252_v16  ;;  %v562_v16 = vld [vmem:[%s1460_s10 + $0x88] sm:$0xff] }
 0x30f   :  { %850 = vmatpush3.bf16.msra.mxu1 %v849_v20  ;;  %761 = vmatprep.mubr.msk.f32.mxu1 %vm946_vm5, %v947_v41  ;;  %v889_v20 = vpack.c.bf16 %v559_v15, %v557_v14  ;;  %v891_v21 = vpack.c.bf16 %v564_v19, %v562_v16 }
 0x310   :  { %851 = vmatprep.subr.bf16.mxu1 %v945_v40 }
 0x311   :  { %890 = vmatpush1.bf16.msra.mxu0 %v889_v20 }
 0x312   :  { %892 = vmatprep.subr.bf16.mxu0 %v891_v21 }
 0x313   :  { %853 = vmatpush3.bf16.msra.mxu1 %v852_v23  ;;  %v563_v23 = vld [vmem:[%s1460_s10 + $0x90] sm:$0xff] }
 0x314   :  { %854 = vmatprep.subr.bf16.mxu1 %v945_v40 }
 0x317   :  { %856 = vmatpush3.bf16.msra.mxu1 %v855_v24  ;;  %v893_v24 = vpack.c.bf16 %v563_v23, %v561_v22 }
 0x318   :  { %857 = vmatprep.subr.bf16.mxu1 %v945_v40 }
 0x319   :  { %894 = vmatpush1.bf16.msra.mxu0 %v893_v24 }
 0x31a   :  { %896 = vmatprep.subr.bf16.mxu0 %v895_v25 }
 0x31b   :  { %859 = vmatpush3.bf16.msra.mxu1 %v858_v27  ;;  %v567_v27 = vld [vmem:[%s1460_s10 + $0xb0] sm:$0xff] }
 0x31c   :  { %860 = vmatprep.subr.bf16.mxu1 %v945_v40 }
 0x31f   :  { %862 = vmatpush3.bf16.msra.mxu1 %v861_v30  ;;  %v897_v30 = vpack.c.bf16 %v567_v27, %v565_v26 }
 0x320   :  { %863 = vmatprep.subr.bf16.mxu1 %v945_v40 }
 0x321   :  { %898 = vmatpush1.bf16.msra.mxu0 %v897_v30 }
 0x322   :  { %900 = vmatprep.subr.bf16.mxu0 %v899_v31 }
 0x323   :  { %865 = vmatpush3.bf16.msra.mxu1 %v864_v33  ;;  %v571_v33 = vld [vmem:[%s1460_s10 + $0xd0] sm:$0xff] }
 0x324   :  { %866 = vmatprep.subr.bf16.mxu1 %v945_v40 }
 0x327   :  { %868 = vmatpush3.bf16.msra.mxu1 %v867_v36  ;;  %v901_v36 = vpack.c.bf16 %v571_v33, %v569_v32 }
 0x328   :  { %869 = vmatprep.subr.bf16.mxu1 %v945_v40 }
 0x329   :  { %902 = vmatpush1.bf16.msra.mxu0 %v901_v36 }
 0x32a   :  { %904 = vmatprep.subr.bf16.mxu0 %v903_v37 }
 0x32b   :  { %871 = vmatpush3.bf16.msra.mxu1 %v870_v39 }
 0x32c   :  { %872 = vmatprep.subr.bf16.mxu1 %v945_v40  ;;  %v459_v40 = vld [vmem:[%s1458_s8 + $0x8] sm:$0xff] }
 0x32d   :  { %v873_v48 = vpack.c.bf16 %v459_v40, %v458_v47 }
 0x3e1   :  { %v349_v43 = vpop.f32.mrb[0].mxu1 }
 0x3e2   :  { %v350_v44 = vadd.f32 %v699_v42, %v349_v43  ;;  %v351_v45 = vpop.f32.mrb[1].mxu1  ;;  %v573_v43 = vld [vmem:[%s1460_s10 + $0xe0] sm:$0xff] }
 0x3e4   :  { %v353_v46 = vmax.f32 %v350_v44, 0.0  ;;  %v575_v44 = vld [vmem:[%s1460_s10 + $0xf0] sm:$0xff] }
 0x3e5   :  { %v905_v45 = vpack.c.bf16 %v575_v44, %v573_v43 }
 0x3e6   :  { %762 = vmatmul.mubr.f32.vlgmr.msra.gmra.mrb[2].mxu1 %v353_v46  ;;  %v702_v46 = vld [vmem:[%s1459_s9] ss:$0 sm:$0xff] }
 0x3e7   :  { %770 = vmatprep.mubr.msk.f32.mxu1 %vm946_vm5, %v947_v41  ;;  %874 = vmatpush3.bf16.msra.mxu1 %v873_v48 }
 0x3e8   :  { %768 = vmatprep.subr.mxu1 %v947_v41  ;;  %906 = vmatpush1.bf16.msra.mxu0 %v905_v45 }
 0x3eb   :  { %769 = vmatpush3.msk.msra.mxu1 %vm122_vm1, %v460_v55 }
 0x4b9   :  { %v443_v50 = vpop.f32.mrb[2].mxu1 }
 0x4ba   :  { %v1330_v51 = vadd.f32 %v701_v49, %v443_v50  ;;  %v763_v52 = vpop.f32.mrb[3].mxu1  ;;  %v579_v49 = vlaneseq }
 0x4bb   :  { %v577_v52 = vld [vmem:[%s1461_s11] sm:$0x3] }
 0x4bc   :  { %447 = vst [vmem:[%s1463_s13] sm:$0x3] %v1330_v51  ;;  %v449_v53 = vmul.f32 0.5, %v1330_v51  ;;  %v580_v50 = vshrl.u32 %v579_v49, 7 }
 0x4be   :  { %v450_v54 = vmul.f32 1.442695, %v449_v53  ;;  %v585_v53 = vsub.s32 1, %v580_v50 }
 0x4c0   :  { %920 = vpow2.f32 %v450_v54  ;;  %v586_v55 = vrot.slane %v577_v52, %v585_v53 }
 0x4ca   :  { %v921_v11 = vpop.eup %920 }
 0x4cb   :  { %453 = vrot.lane.b32.xlu1 %v921_v11, %s948_s15 }
 0x53d   :  { %v454_v39 = vpop.permute.xlu1 %453 }
 0x53e   :  { %v456_v41 = vmul.f32 %v454_v39, %v448_v38 }
 0x540   :  { %v457_v42 = vadd.f32 %v456_v41, %v1330_v51  ;;  %v581_v51 = vsub.s32 0, %v580_v50 }
 0x542   :  { %771 = vmatmul.mubr.msk.f32.vlgmr.msra.gmra.mrb[4].mxu1 %vm468_vm6, %v457_v42  ;;  %v582_v54 = vrot.slane %v577_v52, %v581_v51 }
 0x615   :  { %v541_v47 = vpop.f32.mrb[4].mxu1 }
 0x616   :  { %v542_v40 = vadd.f32 %v702_v46, %v541_v47  ;;  %v772_v48 = vpop.f32.mrb[5].mxu1 }
 0x618   :  { %654 = vmatmul.mubr.f32.vlgmr.msra.gmra.mrb[2].mxu0 %v542_v40 }
 0x6eb   :  { %v655_v56 = vpop.f32.mrb[2].mxu0 }
 0x6ec   :  { %v656_v57 = vadd.f32 %v655_v56, %v582_v54  ;;  %v657_v58 = vpop.f32.mrb[3].mxu0 }
 0x6ed   :  { %v658_v59 = vadd.f32 %v657_v58, %v586_v55 }
 0x6ee   :  { %v705_v60 = vmul.f32 -1.442695, %v656_v57 }
 0x6ef   :  { %v706_v61 = vmul.f32 -1.442695, %v658_v59 }
 0x6f0   :  { %922 = vpow2.f32 %v705_v60 }
 0x6f1   :  { %924 = vpow2.f32 %v706_v61 }
 0x6fa   :  { %v923_v62 = vpop.eup %922 }
 0x6fb   :  { %v925_v63 = vpop.eup %924  ;;  %v666_v0 = vadd.f32 1.0, %v923_v62 }
 0x6fc   :  { %v667_v1 = vadd.f32 1.0, %v925_v63 }
 0x6fd   :  { %926 = vrcp.f32 %v666_v0 }
 0x6fe   :  { %928 = vrcp.f32 %v667_v1 }
 0x707   :  { %v927_v2 = vpop.eup %926 }
 0x708   :  { %v929_v3 = vpop.eup %928 }
 0x709   :  { %v674_v4 = vcombine.low %v927_v2, %v929_v3 }
 0x70b   :  { %707 = vst.sshfl [vmem:[%s1462_s12] sm:$0x33 pattern:$0x76325410] %v674_v4 }
 0x70c   :  { %692 = vsyncpa [#allocation3], 1 }

</bundles_post_ra>
